<compile_context>
chip_gen: v7x
topology: tpu7x:2x2x1
jax: 0.10.0
libtpu: 0.0.40
codegen_flags: <defaults>
</compile_context>

<pallas_src>
import jax
import jax.numpy as jnp
from jax.experimental import pallas as pl
from jax.experimental.pallas import tpu as pltpu


def _round_up(x, m):
    return ((x + m - 1) // m) * m


def _mlp_kernel(s_ref, a_ref,
                w1s_ref, w1a_ref, b1_ref,
                w2_ref, b2_ref,
                w3_ref, b3_ref,
                w4r_ref, b4_ref,
                o_ref):
    """One batch tile of the 4-layer MLP; all hidden matmuls hit the MXU."""
    # fc1 on split inputs (equivalent to concat(state, action) @ W1 + b1).
    h = (jnp.dot(s_ref[...], w1s_ref[...], preferred_element_type=jnp.float32)
         + jnp.dot(a_ref[...], w1a_ref[...], preferred_element_type=jnp.float32)
         + b1_ref[...])
    h = jnp.maximum(h, 0.0)

    h = jnp.dot(h, w2_ref[...], preferred_element_type=jnp.float32) + b2_ref[...]
    h = jnp.maximum(h, 0.0)

    h = jnp.dot(h, w3_ref[...], preferred_element_type=jnp.float32) + b3_ref[...]
    h = jnp.maximum(h, 0.0)

    # fc4 (hidden -> 1) as a VPU multiply + lane reduction (no N=1 MXU matmul).
    out = jnp.sum(h * w4r_ref[...], axis=-1, keepdims=True) + b4_ref[...]
    o_ref[...] = out.astype(o_ref.dtype)


def cost_estimator_forward(state, action, params, *, tile_b=None):
    """Pallas-backed equivalent of CostEstimator.forward.

    state:  [B, state_shape]   (cast to f32, like .float())
    action: [B, action_shape]
    params: dict of w1,b1,...,w4,b4 with weights [in, out], biases [1, out]
    returns cost_estimate: [B, 1] float32
    """
    state = state.astype(jnp.float32)
    action = action.astype(jnp.float32)
    B, S = state.shape
    _, A = action.shape
    H = params["w1"].shape[1]

    # Batch tile: multiple of 8 (f32 sublane), capped so double-buffered
    # input/output tiles stay far under the 32 MiB scoped VMEM on v7x.
    if tile_b is None:
        tile_b = min(2048, _round_up(B, 8))
    tile_b = max(8, _round_up(int(tile_b), 8))
    B_pad = _round_up(B, tile_b)
    if B_pad != B:
        pad = B_pad - B
        state = jnp.pad(state, ((0, pad), (0, 0)))
        action = jnp.pad(action, ((0, pad), (0, 0)))

    # Split W1 so no concatenated [B, S+A] tensor ever hits HBM.
    w1 = params["w1"]
    w1s, w1a = w1[:S, :], w1[S:, :]
    w4_row = params["w4"].reshape(1, H)

    def resident(arr):
        # Full-array block with a constant index_map -> stays VMEM-resident.
        return pl.BlockSpec(arr.shape, lambda i: (0, 0))

    grid = (B_pad // tile_b,)

    out = pl.pallas_call(
        _mlp_kernel,
        out_shape=jax.ShapeDtypeStruct((B_pad, 1), jnp.float32),
        grid=grid,
        in_specs=[
            pl.BlockSpec((tile_b, S), lambda i: (i, 0)),
            pl.BlockSpec((tile_b, A), lambda i: (i, 0)),
            resident(w1s), resident(w1a), resident(params["b1"]),
            resident(params["w2"]), resident(params["b2"]),
            resident(params["w3"]), resident(params["b3"]),
            resident(w4_row), resident(params["b4"]),
        ],
        out_specs=pl.BlockSpec((tile_b, 1), lambda i: (i, 0)),
        compiler_params=pltpu.CompilerParams(
            dimension_semantics=("parallel",)),
    )(state, action,
      w1s, w1a, params["b1"],
      params["w2"], params["b2"],
      params["w3"], params["b3"],
      w4_row, params["b4"])

    return out[:B]


def init_params(key, input_dim, hidden_dim):
    """Deterministic synthetic parameter init (PyTorch-Linear-like uniform bounds)."""
    ks = jax.random.split(key, 8)

    def linear(kw, kb, fan_in, fan_out):
        bound = 1.0 / jnp.sqrt(jnp.float32(fan_in))
        w = jax.random.uniform(kw, (fan_in, fan_out), jnp.float32, -bound, bound)
        b = jax.random.uniform(kb, (1, fan_out), jnp.float32, -bound, bound)
        return w, b

    w1, b1 = linear(ks[0], ks[1], input_dim, hidden_dim)
    w2, b2 = linear(ks[2], ks[3], hidden_dim, hidden_dim)
    w3, b3 = linear(ks[4], ks[5], hidden_dim, hidden_dim)
    w4, b4 = linear(ks[6], ks[7], hidden_dim, 1)
    return dict(w1=w1, b1=b1, w2=w2, b2=b2, w3=w3, b3=b3, w4=w4, b4=b4)


def reference_forward(state, action, p):
    x = jnp.concatenate(
        [state.astype(jnp.float32), action.astype(jnp.float32)], axis=-1)
    x = jax.nn.relu(x @ p["w1"] + p["b1"])
    x = jax.nn.relu(x @ p["w2"] + p["b2"])
    x = jax.nn.relu(x @ p["w3"] + p["b3"])
    return x @ p["w4"] + p["b4"]


if __name__ == "__main__":
    state_shape = 24
    action_shape = 8
    hidden_dim = 32          # args.config['cost_hidden_dim']
    input_dim = state_shape + action_shape

    key = jax.random.PRNGKey(0)
    k_state, k_action, k_params = jax.random.split(key, 3)
    params = init_params(k_params, input_dim, hidden_dim)

    # Test 1: small batch, single grid tile.
    b1 = 8
    s1 = jax.random.normal(k_state, (b1, state_shape), jnp.float32)
    a1 = jax.random.normal(k_action, (b1, action_shape), jnp.float32)
    out1 = jax.block_until_ready(cost_estimator_forward(s1, a1, params))
    ref1 = reference_forward(s1, a1, params)
    assert out1.shape == (b1, 1), out1.shape
    assert jnp.allclose(out1, ref1, atol=1e-5, rtol=1e-5)

    # Test 2: batch not divisible by the tile -> exercises padding + multi-tile grid.
    b2 = 20
    s2 = jax.random.normal(jax.random.PRNGKey(1), (b2, state_shape), jnp.float32)
    a2 = jax.random.normal(jax.random.PRNGKey(2), (b2, action_shape), jnp.float32)
    out2 = jax.block_until_ready(
        cost_estimator_forward(s2, a2, params, tile_b=8))
    ref2 = reference_forward(s2, a2, params)
    assert out2.shape == (b2, 1), out2.shape
    assert jnp.allclose(out2, ref2, atol=1e-5, rtol=1e-5)

    print("KERNEL_OK")
</pallas_src>

<mosaic_0001>
module attributes {stable_mosaic.version = 11 : i64} {
  func.func @_mlp_kernel(%arg0: i32, %arg1: memref<8x24xf32, #tpu.memory_space<vmem>>, %arg2: memref<8x8xf32, #tpu.memory_space<vmem>>, %arg3: memref<24x32xf32, #tpu.memory_space<vmem>>, %arg4: memref<8x32xf32, #tpu.memory_space<vmem>>, %arg5: memref<1x32xf32, #tpu.memory_space<vmem>>, %arg6: memref<32x32xf32, #tpu.memory_space<vmem>>, %arg7: memref<1x32xf32, #tpu.memory_space<vmem>>, %arg8: memref<32x32xf32, #tpu.memory_space<vmem>>, %arg9: memref<1x32xf32, #tpu.memory_space<vmem>>, %arg10: memref<1x32xf32, #tpu.memory_space<vmem>>, %arg11: memref<1x1xf32, #tpu.memory_space<vmem>>, %arg12: memref<8x1xf32, #tpu.memory_space<vmem>>) attributes {dimension_semantics = [#tpu.dimension_semantics<parallel>], iteration_bounds = array<i64: 1>, scalar_prefetch = 0 : i64, scratch_operands = 0 : i64, tpu.core_type = #tpu.core_type<tc>, window_params = [{transform_indices = @transform_0, window_bounds = array<i64: 8, 24>}, {transform_indices = @transform_1, window_bounds = array<i64: 8, 8>}, {pipeline_mode = #tpu.pipeline_mode<synchronous>, transform_indices = @transform_2, window_bounds = array<i64: 24, 32>}, {pipeline_mode = #tpu.pipeline_mode<synchronous>, transform_indices = @transform_3, window_bounds = array<i64: 8, 32>}, {pipeline_mode = #tpu.pipeline_mode<synchronous>, transform_indices = @transform_4, window_bounds = array<i64: 1, 32>}, {pipeline_mode = #tpu.pipeline_mode<synchronous>, transform_indices = @transform_5, window_bounds = array<i64: 32, 32>}, {pipeline_mode = #tpu.pipeline_mode<synchronous>, transform_indices = @transform_6, window_bounds = array<i64: 1, 32>}, {pipeline_mode = #tpu.pipeline_mode<synchronous>, transform_indices = @transform_7, window_bounds = array<i64: 32, 32>}, {pipeline_mode = #tpu.pipeline_mode<synchronous>, transform_indices = @transform_8, window_bounds = array<i64: 1, 32>}, {pipeline_mode = #tpu.pipeline_mode<synchronous>, transform_indices = @transform_9, window_bounds = array<i64: 1, 32>}, {pipeline_mode = #tpu.pipeline_mode<synchronous>, transform_indices = @transform_10, window_bounds = array<i64: 1, 1>}, {transform_indices = @transform_11, window_bounds = array<i64: 8, 1>}]} {
    %c0 = arith.constant 0 : index
    %c0_0 = arith.constant 0 : index
    %0 = vector.load %arg1[%c0, %c0_0] : memref<8x24xf32, #tpu.memory_space<vmem>>, vector<8x24xf32>
    %c0_1 = arith.constant 0 : index
    %c0_2 = arith.constant 0 : index
    %1 = vector.load %arg3[%c0_1, %c0_2] : memref<24x32xf32, #tpu.memory_space<vmem>>, vector<24x32xf32>
    %cst = arith.constant dense<0.000000e+00> : vector<8x32xf32>
    %2 = tpu.matmul %0, %1, %cst {dimension_numbers = #tpu.dot_dimension_numbers<[1], [0], [0], [1], [0, 0, 1, 1], [], []>} : vector<8x24xf32>, vector<24x32xf32>, vector<8x32xf32> -> vector<8x32xf32>
    %c0_3 = arith.constant 0 : index
    %c0_4 = arith.constant 0 : index
    %3 = vector.load %arg2[%c0_3, %c0_4] : memref<8x8xf32, #tpu.memory_space<vmem>>, vector<8x8xf32>
    %c0_5 = arith.constant 0 : index
    %c0_6 = arith.constant 0 : index
    %4 = vector.load %arg4[%c0_5, %c0_6] : memref<8x32xf32, #tpu.memory_space<vmem>>, vector<8x32xf32>
    %cst_7 = arith.constant dense<0.000000e+00> : vector<8x32xf32>
    %5 = tpu.matmul %3, %4, %cst_7 {dimension_numbers = #tpu.dot_dimension_numbers<[1], [0], [0], [1], [0, 0, 1, 1], [], []>} : vector<8x8xf32>, vector<8x32xf32>, vector<8x32xf32> -> vector<8x32xf32>
    %6 = arith.addf %2, %5 : vector<8x32xf32>
    %c0_8 = arith.constant 0 : index
    %c0_9 = arith.constant 0 : index
    %7 = vector.load %arg5[%c0_8, %c0_9] : memref<1x32xf32, #tpu.memory_space<vmem>>, vector<1x32xf32>
    %8 = vector.broadcast %7 : vector<1x32xf32> to vector<8x32xf32>
    %9 = arith.addf %6, %8 : vector<8x32xf32>
    %cst_10 = arith.constant 0.000000e+00 : f32
    %10 = vector.broadcast %cst_10 : f32 to vector<8x32xf32>
    %11 = arith.maximumf %9, %10 : vector<8x32xf32>
    %c0_11 = arith.constant 0 : index
    %c0_12 = arith.constant 0 : index
    %12 = vector.load %arg6[%c0_11, %c0_12] : memref<32x32xf32, #tpu.memory_space<vmem>>, vector<32x32xf32>
    %cst_13 = arith.constant dense<0.000000e+00> : vector<8x32xf32>
    %13 = tpu.matmul %11, %12, %cst_13 {dimension_numbers = #tpu.dot_dimension_numbers<[1], [0], [0], [1], [0, 0, 1, 1], [], []>} : vector<8x32xf32>, vector<32x32xf32>, vector<8x32xf32> -> vector<8x32xf32>
    %c0_14 = arith.constant 0 : index
    %c0_15 = arith.constant 0 : index
    %14 = vector.load %arg7[%c0_14, %c0_15] : memref<1x32xf32, #tpu.memory_space<vmem>>, vector<1x32xf32>
    %15 = vector.broadcast %14 : vector<1x32xf32> to vector<8x32xf32>
    %16 = arith.addf %13, %15 : vector<8x32xf32>
    %cst_16 = arith.constant 0.000000e+00 : f32
    %17 = vector.broadcast %cst_16 : f32 to vector<8x32xf32>
    %18 = arith.maximumf %16, %17 : vector<8x32xf32>
    %c0_17 = arith.constant 0 : index
    %c0_18 = arith.constant 0 : index
    %19 = vector.load %arg8[%c0_17, %c0_18] : memref<32x32xf32, #tpu.memory_space<vmem>>, vector<32x32xf32>
    %cst_19 = arith.constant dense<0.000000e+00> : vector<8x32xf32>
    %20 = tpu.matmul %18, %19, %cst_19 {dimension_numbers = #tpu.dot_dimension_numbers<[1], [0], [0], [1], [0, 0, 1, 1], [], []>} : vector<8x32xf32>, vector<32x32xf32>, vector<8x32xf32> -> vector<8x32xf32>
    %c0_20 = arith.constant 0 : index
    %c0_21 = arith.constant 0 : index
    %21 = vector.load %arg9[%c0_20, %c0_21] : memref<1x32xf32, #tpu.memory_space<vmem>>, vector<1x32xf32>
    %22 = vector.broadcast %21 : vector<1x32xf32> to vector<8x32xf32>
    %23 = arith.addf %20, %22 : vector<8x32xf32>
    %cst_22 = arith.constant 0.000000e+00 : f32
    %24 = vector.broadcast %cst_22 : f32 to vector<8x32xf32>
    %25 = arith.maximumf %23, %24 : vector<8x32xf32>
    %c0_23 = arith.constant 0 : index
    %c0_24 = arith.constant 0 : index
    %26 = vector.load %arg10[%c0_23, %c0_24] : memref<1x32xf32, #tpu.memory_space<vmem>>, vector<1x32xf32>
    %27 = vector.broadcast %26 : vector<1x32xf32> to vector<8x32xf32>
    %28 = arith.mulf %25, %27 : vector<8x32xf32>
    %cst_25 = arith.constant dense<0.000000e+00> : vector<8xf32>
    %29 = vector.multi_reduction <add>, %28, %cst_25 [1] : vector<8x32xf32> to vector<8xf32>
    %30 = vector.shape_cast %29 : vector<8xf32> to vector<8x1xf32>
    %c0_26 = arith.constant 0 : index
    %c0_27 = arith.constant 0 : index
    %31 = vector.load %arg11[%c0_26, %c0_27] : memref<1x1xf32, #tpu.memory_space<vmem>>, vector<1x1xf32>
    %32 = vector.broadcast %31 : vector<1x1xf32> to vector<8x1xf32>
    %33 = arith.addf %30, %32 : vector<8x1xf32>
    %c0_28 = arith.constant 0 : index
    %c0_29 = arith.constant 0 : index
    %34 = vector.load %arg12[%c0_28, %c0_29] : memref<8x1xf32, #tpu.memory_space<vmem>>, vector<8x1xf32>
    tpu.vector_store %arg12[%c0_28, %c0_29], %33 {strides = array<i32>} : memref<8x1xf32, #tpu.memory_space<vmem>>, vector<8x1xf32>,
    return
  }
  func.func @transform_0(%arg0: i32) -> (i32, i32) {
    %c0_i32 = arith.constant 0 : i32
    %c0_i32_0 = arith.constant 0 : i32
    return %arg0, %c0_i32 : i32, i32
  }
  func.func @transform_1(%arg0: i32) -> (i32, i32) {
    %c0_i32 = arith.constant 0 : i32
    %c0_i32_0 = arith.constant 0 : i32
    return %arg0, %c0_i32 : i32, i32
  }
  func.func @transform_2(%arg0: i32) -> (i32, i32) {
    %c0_i32 = arith.constant 0 : i32
    %c0_i32_0 = arith.constant 0 : i32
    %c0_i32_1 = arith.constant 0 : i32
    return %c0_i32, %c0_i32_0 : i32, i32
  }
  func.func @transform_3(%arg0: i32) -> (i32, i32) {
    %c0_i32 = arith.constant 0 : i32
    %c0_i32_0 = arith.constant 0 : i32
    %c0_i32_1 = arith.constant 0 : i32
    return %c0_i32, %c0_i32_0 : i32, i32
  }
  func.func @transform_4(%arg0: i32) -> (i32, i32) {
    %c0_i32 = arith.constant 0 : i32
    %c0_i32_0 = arith.constant 0 : i32
    %c0_i32_1 = arith.constant 0 : i32
    return %c0_i32, %c0_i32_0 : i32, i32
  }
  func.func @transform_5(%arg0: i32) -> (i32, i32) {
    %c0_i32 = arith.constant 0 : i32
    %c0_i32_0 = arith.constant 0 : i32
    %c0_i32_1 = arith.constant 0 : i32
    return %c0_i32, %c0_i32_0 : i32, i32
  }
  func.func @transform_6(%arg0: i32) -> (i32, i32) {
    %c0_i32 = arith.constant 0 : i32
    %c0_i32_0 = arith.constant 0 : i32
    %c0_i32_1 = arith.constant 0 : i32
    return %c0_i32, %c0_i32_0 : i32, i32
  }
  func.func @transform_7(%arg0: i32) -> (i32, i32) {
    %c0_i32 = arith.constant 0 : i32
    %c0_i32_0 = arith.constant 0 : i32
    %c0_i32_1 = arith.constant 0 : i32
    return %c0_i32, %c0_i32_0 : i32, i32
  }
  func.func @transform_8(%arg0: i32) -> (i32, i32) {
    %c0_i32 = arith.constant 0 : i32
    %c0_i32_0 = arith.constant 0 : i32
    %c0_i32_1 = arith.constant 0 : i32
    return %c0_i32, %c0_i32_0 : i32, i32
  }
  func.func @transform_9(%arg0: i32) -> (i32, i32) {
    %c0_i32 = arith.constant 0 : i32
    %c0_i32_0 = arith.constant 0 : i32
    %c0_i32_1 = arith.constant 0 : i32
    return %c0_i32, %c0_i32_0 : i32, i32
  }
  func.func @transform_10(%arg0: i32) -> (i32, i32) {
    %c0_i32 = arith.constant 0 : i32
    %c0_i32_0 = arith.constant 0 : i32
    %c0_i32_1 = arith.constant 0 : i32
    return %c0_i32, %c0_i32_0 : i32, i32
  }
  func.func @transform_11(%arg0: i32) -> (i32, i32) {
    %c0_i32 = arith.constant 0 : i32
    %c0_i32_0 = arith.constant 0 : i32
    return %arg0, %c0_i32 : i32, i32
  }
}

</mosaic_0001>

<bundles_post_ra>
// kernel: tpu_custom_call.1
= control target key start
LH: loop header
LB: loop body
LE: loop exit
PB: predicated region body
PF: predicated region fallthrough
CT: control target
= control target key end

     0   :  { %s835_s0 = inlined_call_operand.hbm [shape: f32[8,24], index: 0, kind: input, shape index: {}]   ;;  %s836_s1 = inlined_call_operand.hbm [shape: f32[8,8], index: 1, kind: input, shape index: {}]   ;;  %s837_s2 = inlined_call_operand.hbm [shape: f32[24,32], index: 2, kind: input, shape index: {}]   ;;  %s838_s3 = inlined_call_operand.vmem [shape: f32[8,32], index: 3, kind: input, shape index: {}]   ;;  %s839_s4 = inlined_call_operand.vmem [shape: f32[1,32], index: 4, kind: input, shape index: {}]   ;;  %s840_s5 = inlined_call_operand.hbm [shape: f32[32,32], index: 5, kind: input, shape index: {}]   ;;  %s841_s6 = inlined_call_operand.vmem [shape: f32[1,32], index: 6, kind: input, shape index: {}]   ;;  %s842_s7 = inlined_call_operand.hbm [shape: f32[32,32], index: 7, kind: input, shape index: {}]   ;;  %s843_s8 = inlined_call_operand.vmem [shape: f32[1,32], index: 8, kind: input, shape index: {}]   ;;  %s844_s9 = inlined_call_operand.vmem [shape: f32[1,32], index: 9, kind: input, shape index: {}]   ;;  %s845_s10 = inlined_call_operand.<no memory space> [shape: f32[1,1], index: 10, kind: input, shape index: {}]   ;;  %s846_s11 = inlined_call_operand.vmem [shape: f32[8,1], index: 11, kind: output, shape index: {}]  }
   0x1   :  { %v16_v0 = vstv %s845_s10 }
   0x2   :  { %17 = vst [vmem:[#allocation2] sm:$0x1] %v16_v0 }
   0x3   :  { %18 = vsyncpa [#allocation4], 0 }
   0x4   :  { %19 = vsyncpa [#allocation6], 0 }
   0x5   :  { %20 = vsyncpa [#allocation9], 0  ;;  %s668_s19 = smov [#allocation5]   ;;  %s552_s23 = scalar_lea.hbm %s836_s1, 128 }
   0x6   :  { %s37_s20 = sshll.u32 %s668_s19, 4  ;;  %p553_p0 = scmp.ne.s32.totalorder %s836_s1, %s552_s23  ;;  %s38_s20 = int_to_ptr.vmem [resolvable:$true] %s37_s20 }
   0x7   :  { %p556_p1 = scmp.lt.u32.totalorder %s552_s23, %s836_s1 }
   0x9   :  { %p558_p2 = pnand %p556_p1, %p553_p0 }
   0xb   :  { %561 = shalt.err (!%p558_p2)
}
   0xc   :  { %s562_s10 = scalar_lea.vmem %s38_s20, 128  ;;  %p567_p4 = scmp.lt.s32.totalorder %s38_s20, %s38_s20 }
   0xd   :  { %p563_p3 = scmp.ne.s32.totalorder %s38_s20, %s562_s10  ;;  %p568_p5 = scmp.lt.s32.totalorder %s562_s10, %s562_s10 }
   0xf   :  { %p569_p6 = por %p568_p5, %p567_p4 }
  0x11   :  { %p570_p7 = pnand %p569_p6, %p563_p3 }
  0x13   :  { %573 = shalt.err (!%p570_p7)
}
  0x14   :  { %40 = dma.hbm_to_vmem [thread:$0]  %s836_s1, 128, %s38_s20, [#allocation6]  }
  0x15   :  { %s669_s30 = smov [#allocation8]   ;;  %s670_s13 = smov [#allocation3]  }
  0x16   :  { %s62_s12 = sshll.u32 %s669_s30, 4  ;;  %s27_s14 = sshll.u32 %s670_s13, 4  ;;  %s63_s12 = int_to_ptr.vmem [resolvable:$true] %s62_s12  ;;  %s28_s14 = int_to_ptr.vmem [resolvable:$true] %s27_s14 }
  0x17   :  { %s574_s17 = scalar_lea.hbm %s840_s5, 512 }
  0x18   :  { %p575_p8 = scmp.ne.s32.totalorder %s840_s5, %s574_s17  ;;  %p578_p9 = scmp.lt.u32.totalorder %s574_s17, %s840_s5 }
  0x1a   :  { %p580_p10 = pnand %p578_p9, %p575_p8 }
  0x1c   :  { %583 = shalt.err (!%p580_p10)
}
  0x1d   :  { %s584_s1 = scalar_lea.vmem %s63_s12, 512  ;;  %p589_p12 = scmp.lt.s32.totalorder %s63_s12, %s63_s12 }
  0x1e   :  { %p585_p11 = scmp.ne.s32.totalorder %s63_s12, %s584_s1  ;;  %p590_p13 = scmp.lt.s32.totalorder %s584_s1, %s584_s1 }
  0x20   :  { %p591_p0 = por %p590_p13, %p589_p12 }
  0x22   :  { %p592_p1 = pnand %p591_p0, %p585_p11 }
  0x24   :  { %595 = shalt.err (!%p592_p1)
}
  0x25   :  { %s671_s20 = smov 128   ;;  %s672_s23 = smov 8  }
  0x26   :  { %68 = dma.hbm_to_vmem [thread:$0]  %s840_s5, 512, %s63_s12, [#allocation9], %s671_s20, %s671_s20, %s672_s23  }
  0x27   :  { %s596_s10 = scalar_lea.hbm %s835_s0, 128 }
  0x28   :  { %p597_p2 = scmp.ne.s32.totalorder %s835_s0, %s596_s10  ;;  %p600_p3 = scmp.lt.u32.totalorder %s596_s10, %s835_s0 }
  0x2a   :  { %p602_p4 = pnand %p600_p3, %p597_p2 }
  0x2c   :  { %605 = shalt.err (!%p602_p4)
}
  0x2d   :  { %s606_s15 = scalar_lea.vmem %s28_s14, 128  ;;  %p611_p6 = scmp.lt.s32.totalorder %s28_s14, %s28_s14 }
  0x2e   :  { %p607_p5 = scmp.ne.s32.totalorder %s28_s14, %s606_s15  ;;  %p612_p7 = scmp.lt.s32.totalorder %s606_s15, %s606_s15 }
  0x30   :  { %p613_p8 = por %p612_p7, %p611_p6 }
  0x32   :  { %p614_p9 = pnand %p613_p8, %p607_p5 }
  0x34   :  { %617 = shalt.err (!%p614_p9)
}
  0x35   :  { %30 = dma.hbm_to_vmem [thread:$0]  %s835_s0, 128, %s28_s14, [#allocation4]  }
  0x36   :  { %s673_s16 = smov [#allocation7]   ;;  %s674_s18 = smov [#allocation10]  }
  0x37   :  { %s46_s17 = sshll.u32 %s673_s16, 4  ;;  %s76_s19 = sshll.u32 %s674_s18, 4  ;;  %s47_s17 = int_to_ptr.vmem [resolvable:$true] %s46_s17  ;;  %s77_s19 = int_to_ptr.vmem [resolvable:$true] %s76_s19 }
  0x38   :  { %s618_s1 = scalar_lea.hbm %s837_s2, 384 }
  0x39   :  { %p619_p10 = scmp.ne.s32.totalorder %s837_s2, %s618_s1  ;;  %p622_p11 = scmp.lt.u32.totalorder %s618_s1, %s837_s2 }
  0x3b   :  { %p624_p12 = pnand %p622_p11, %p619_p10 }
  0x3d   :  { %627 = shalt.err (!%p624_p12)
}
  0x3e   :  { %s628_s0 = scalar_lea.vmem %s47_s17, 384  ;;  %p633_p0 = scmp.lt.s32.totalorder %s47_s17, %s47_s17 }
  0x3f   :  { %p629_p13 = scmp.ne.s32.totalorder %s47_s17, %s628_s0  ;;  %p634_p1 = scmp.lt.s32.totalorder %s628_s0, %s628_s0 }
  0x41   :  { %p635_p2 = por %p634_p1, %p633_p0 }
  0x43   :  { %p636_p3 = pnand %p635_p2, %p629_p13 }
  0x45   :  { %639 = shalt.err (!%p636_p3)
}
  0x46   :  { %52 = dma.hbm_to_vmem [thread:$0]  %s837_s2, 384, %s47_s17, [#allocation6], %s671_s20, %s671_s20, %s672_s23  }
  0x47   :  { %s640_s30 = scalar_lea.hbm %s842_s7, 512 }
  0x48   :  { %p641_p4 = scmp.ne.s32.totalorder %s842_s7, %s640_s30  ;;  %p644_p5 = scmp.lt.u32.totalorder %s640_s30, %s842_s7 }
  0x4a   :  { %p646_p6 = pnand %p644_p5, %p641_p4 }
  0x4c   :  { %649 = shalt.err (!%p646_p6)
}
  0x4d   :  { %s650_s16 = scalar_lea.vmem %s77_s19, 512  ;;  %p655_p8 = scmp.lt.s32.totalorder %s77_s19, %s77_s19 }
  0x4e   :  { %p651_p7 = scmp.ne.s32.totalorder %s77_s19, %s650_s16  ;;  %p656_p9 = scmp.lt.s32.totalorder %s650_s16, %s650_s16 }
  0x50   :  { %p657_p10 = por %p656_p9, %p655_p8 }
  0x52   :  { %p658_p11 = pnand %p657_p10, %p651_p7 }
  0x54   :  { %661 = shalt.err (!%p658_p11)
}
  0x55   :  { %82 = dma.hbm_to_vmem [thread:$0]  %s842_s7, 512, %s77_s19, [#allocation9], %s671_s20, %s671_s20, %s672_s23  }
  0x56   :  { %662 = dma.done.wait [#allocation4], 128  }
  0x57   :  { %663 = vsyncadd [#allocation4], 4294967168 }
  0x58   :  { %664 = dma.done.wait [#allocation6], 512  }
  0x59   :  { %665 = vsyncadd [#allocation6], 4294966784 }
  0x5a   :  { %666 = dma.done.wait [#allocation9], 1024  }
  0x5b   :  { %667 = vsyncadd [#allocation9], 4294966272  ;;  %v675_v1 = vmov 0.0|0.0   ;;  %v676_v2 = vmov 0.0   ;;  %vm677_vm0 = vmmov 0   ;;  %vm110_vm1 = vcmask 64512  }
  0x5c   :  { %527 = vmatprep.subr.bf16.mxu1 %v675_v1  ;;  %491 = vmatprep.subr.mxu0 %v676_v2  ;;  %v105_v3 = vld [vmem:[#allocation7] sm:$0xff]  ;;  %v106_v4 = vld [vmem:[#allocation7 + $0x8] sm:$0xff]  ;;  %v108_v7 = vld [vmem:[#allocation5] sm:$0xff]  ;;  %vm184_vm2 = vcmask 195584   ;;  %vm278_vm3 = vcmask 261120   ;;  %vm457_vm4 = vcmask 7168  }
  0x5d   :  { %493 = vmatprep.mubr.msk.f32.mxu0 %vm677_vm0, %v676_v2  ;;  %502 = vmatprep.mubr.msk.f32.mxu1 %vm677_vm0, %v676_v2  ;;  %v109_v5 = vld [vmem:[%s838_s3] sm:$0xff]  ;;  %v528_v6 = vpack.c.bf16 %v106_v4, %v105_v3  ;;  %v267_v10 = vld [vmem:[#allocation8] sm:$0xff]  ;;  %v268_v11 = vld [vmem:[#allocation8 + $0x8] sm:$0xff] }
  0x5e   :  { %492 = vmatpush3.msra.mxu0 %v109_v5  ;;  %v107_v8 = vld [vmem:[#allocation7 + $0x10] sm:$0xff]  ;;  %v531_v12 = vpack.c.bf16 %v268_v11, %v267_v10  ;;  %v269_v13 = vld [vmem:[#allocation8 + $0x10] sm:$0xff]  ;;  %v353_v16 = vld [vmem:[#allocation10] sm:$0xff] }
  0x5f   :  { %494 = vmatmul.mubr.msk.f32.vlgmr.msra.gmra.mrb[0].mxu0 %vm110_vm1, %v108_v7  ;;  %530 = vmatprep.subr.bf16.mxu0 %v675_v1  ;;  %v104_v9 = vld [vmem:[#allocation3] sm:$0xff]  ;;  %v354_v17 = vld [vmem:[#allocation10 + $0x8] sm:$0xff]  ;;  %v468_v22 = vld [vmem:[%s839_s4] ss:$0 sm:$0xff] }
  0x60   :  { %529 = vmatpush3.bf16.msra.mxu1 %v528_v6  ;;  %513 = vmatprep.mubr.msk.f32.mxu0 %vm677_vm0, %v676_v2  ;;  %v270_v14 = vld [vmem:[#allocation8 + $0x18] sm:$0xff]  ;;  %v537_v18 = vpack.c.bf16 %v354_v17, %v353_v16  ;;  %v355_v27 = vld [vmem:[#allocation10 + $0x10] sm:$0xff] }
  0x61   :  { %500 = vmatprep.subr.mxu1 %v676_v2  ;;  %532 = vmatpush3.bf16.msra.mxu0 %v531_v12  ;;  %v534_v15 = vpack.c.bf16 %v270_v14, %v269_v13  ;;  %v356_v28 = vld [vmem:[#allocation10 + $0x18] sm:$0xff]  ;;  %v469_v30 = vld [vmem:[%s841_s6] ss:$0 sm:$0xff] }
  0x62   :  { %533 = vmatprep.subr.bf16.mxu0 %v675_v1  ;;  %v540_v29 = vpack.c.bf16 %v356_v28, %v355_v27  ;;  %v471_v35 = vld [vmem:[%s843_s8] ss:$0 sm:$0xff] }
  0x63   :  { %v473_v39 = vld [vmem:[%s844_s9] ss:$0 sm:$0xff] }
  0x64   :  { %501 = vmatpush3.msra.mxu1 %v107_v8  ;;  %v474_v43 = vld [vmem:[#allocation2] ss:$0 sm:$0xff] }
  0x65   :  { %503 = vmatmul.mubr.msk.f32.vlgmr.msra.gmra.mrb[0].mxu1 %vm184_vm2, %v104_v9  ;;  %536 = vmatprep.subr.bf16.mxu1 %v675_v1 }
  0x66   :  { %524 = vmatprep.mubr.msk.f32.mxu1 %vm677_vm0, %v676_v2  ;;  %535 = vmatpush3.bf16.msra.mxu0 %v534_v15 }
  0x67   :  { %538 = vmatpush3.bf16.msra.mxu1 %v537_v18 }
  0x68   :  { %539 = vmatprep.subr.bf16.mxu1 %v675_v1 }
  0x6b   :  { %541 = vmatpush3.bf16.msra.mxu1 %v540_v29 }
 0x132   :  { %v180_v19 = vpop.f32.mrb[0].mxu0 }
 0x133   :  { %v495_v20 = vpop.f32.mrb[1].mxu0 }
 0x138   :  { %v254_v21 = vpop.f32.mrb[0].mxu1 }
 0x139   :  { %v255_v23 = vadd.f32 %v254_v21, %v180_v19  ;;  %v504_v24 = vpop.f32.mrb[1].mxu1 }
 0x13b   :  { %v265_v25 = vadd.f32 %v468_v22, %v255_v23 }
 0x13d   :  { %v266_v26 = vmax.f32 %v265_v25, 0.0 }
 0x13f   :  { %514 = vmatmul.mubr.msk.f32.vlgmr.msra.gmra.mrb[2].mxu0 %vm278_vm3, %v266_v26 }
 0x212   :  { %v348_v31 = vpop.f32.mrb[2].mxu0 }
 0x213   :  { %v349_v32 = vadd.f32 %v469_v30, %v348_v31  ;;  %v515_v33 = vpop.f32.mrb[3].mxu0 }
 0x215   :  { %v352_v34 = vmax.f32 %v349_v32, 0.0 }
 0x217   :  { %525 = vmatmul.mubr.msk.f32.vlgmr.msra.gmra.mrb[2].mxu1 %vm278_vm3, %v352_v34 }
 0x2ea   :  { %v433_v36 = vpop.f32.mrb[2].mxu1 }
 0x2eb   :  { %v434_v37 = vadd.f32 %v471_v35, %v433_v36  ;;  %v526_v38 = vpop.f32.mrb[3].mxu1 }
 0x2ed   :  { %v437_v40 = vmax.f32 %v434_v37, 0.0 }
 0x2ef   :  { %v445_v41 = vmul.f32 %v473_v39, %v437_v40 }
 0x2f1   :  { %v446_v42 = vsel %vm278_vm3, %v445_v41, 0.0 }
 0x2f2   :  { %447 = vadd.xlane.f32.xlu0 %v446_v42 }
 0x37f   :  { %v448_v44 = vpop.xlane.xlu0 %447 }
 0x380   :  { %v456_v45 = vadd.f32 %v474_v43, %v448_v44 }
 0x382   :  { %458 = vst.msk [vmem:[%s846_s11] sm:$0xff] %vm457_vm4, %v456_v45 }
 0x383   :  { %463 = vsyncpa [#allocation4], 1 }
 0x384   :  { %464 = vsyncpa [#allocation6], 1 }
 0x385   :  { %465 = vsyncpa [#allocation9], 1 }

</bundles_post_ra>
